<compile_context>
chip_gen: v7x
topology: tpu7x:2x2x1
jax: 0.10.0
libtpu: 0.0.40
codegen_flags: <defaults>
</compile_context>

<pallas_src>
import jax
import jax.numpy as jnp
import numpy as np
from jax.experimental import pallas as pl
from jax.experimental.pallas import tpu as pltpu

NPAD = 128   # padded node count (lane-dense contraction dim)
FPAD = 128   # padded feature / hidden / output width (one full lane row)
EPAD = 8     # padded edge count (one sublane group)


# ----------------------------- Pallas kernel --------------------------------
def gnn_kernel(m_ref, bias_ref, out_ref):
    # Static, 128-lane-aligned slices of the packed slab (free ref views).
    x  = m_ref[:, 0 * NPAD:1 * NPAD]           # (NPAD, FPAD) bf16  node feats
    w1 = m_ref[:, 1 * NPAD:2 * NPAD]           # (FPAD, FPAD) bf16  layer-1 weight
    a  = m_ref[:, 2 * NPAD:3 * NPAD]           # (NPAD, NPAD) bf16  normalized A_hat
    w2 = m_ref[:, 3 * NPAD:4 * NPAD]           # (FPAD, FPAD) bf16  layer-2 weight
    ga = m_ref[0:EPAD, 4 * NPAD:5 * NPAD]      # (EPAD, NPAD) bf16  A_hat[src] (gather+agg)
    b1 = bias_ref[:, 0:FPAD]                   # (1, FPAD) f32
    b2 = bias_ref[:, FPAD:2 * FPAD]            # (1, FPAD) f32

    # ---- GCN layer 1: relu(A_hat @ (X @ W1) + b1), f32 accumulation ----
    t1 = jnp.dot(x, w1, preferred_element_type=jnp.float32)           # pass 1
    h = jnp.dot(a, t1.astype(jnp.bfloat16),
                preferred_element_type=jnp.float32)                   # pass 2
    h = jnp.maximum(h + b1, 0.0)

    # ---- GCN layer 2 fused with edge gather ----
    # logits[e] = (A_hat @ (H @ W2))[src[e]] + b2  ==  (GA @ (H @ W2))[e] + b2
    t2 = jnp.dot(h.astype(jnp.bfloat16), w2,
                 preferred_element_type=jnp.float32)                  # pass 3
    logits = jnp.dot(ga, t2.astype(jnp.bfloat16),
                     preferred_element_type=jnp.float32) + b2         # pass 4
    out_ref[...] = jax.nn.sigmoid(logits)                             # (EPAD, FPAD) f32


@jax.jit
def run_gnn(mat_slab, bias_slab):
    vmem = lambda: pl.BlockSpec(memory_space=pltpu.MemorySpace.VMEM)
    return pl.pallas_call(
        gnn_kernel,
        out_shape=jax.ShapeDtypeStruct((EPAD, FPAD), jnp.float32),
        in_specs=[vmem(), vmem()],
        out_specs=vmem(),
    )(mat_slab, bias_slab)


# --------------------------- one-time preprocessing --------------------------
def build_gcn_adjacency(edge_index, num_nodes):
    """Dense normalized adjacency with self loops (PyG GCNConv gcn_norm)."""
    src, dst = edge_index[0], edge_index[1]
    loops = jnp.arange(num_nodes, dtype=src.dtype)
    src_sl = jnp.concatenate([src, loops])
    dst_sl = jnp.concatenate([dst, loops])
    deg = jnp.zeros((num_nodes,), jnp.float32).at[dst_sl].add(1.0)
    dinv = 1.0 / jnp.sqrt(deg)                               # deg >= 1 (self loops)
    norm = dinv[src_sl] * dinv[dst_sl]
    return jnp.zeros((num_nodes, num_nodes), jnp.float32).at[dst_sl, src_sl].add(norm)


def prepare_gnn_inputs(x, edge_index, params):
    """Static padding / casting / adjacency build, done ONCE at init (not per call)."""
    w1, b1, w2, b2 = params
    N, f_in = x.shape
    hid = w1.shape[1]
    f_out = w2.shape[1]
    E = edge_index.shape[1]
    assert N <= NPAD, f"N={N} exceeds NPAD={NPAD}"
    assert E <= EPAD, f"E={E} exceeds EPAD={EPAD}"
    assert max(f_in, hid, f_out) <= FPAD, "feature width exceeds FPAD"

    a_hat = build_gcn_adjacency(edge_index, N)       # (N, N) f32
    ga = a_hat[edge_index[0]]                        # (E, N) f32: A_hat folded into gather

    def pad2(m, rows, cols):
        return jnp.zeros((rows, cols), jnp.float32).at[:m.shape[0], :m.shape[1]].set(m)

    # Zero padding is exact: padded rows/cols contribute zeros to every matmul,
    # padded output rows/lanes are sliced off by the caller.
    x_p  = pad2(x, NPAD, FPAD)
    w1_p = pad2(w1, FPAD, FPAD)
    a_p  = pad2(a_hat, NPAD, NPAD)
    w2_p = pad2(w2, FPAD, FPAD)
    ga_p = pad2(ga, NPAD, NPAD)                      # kernel reads only first EPAD rows

    mat_slab = jnp.concatenate([x_p, w1_p, a_p, w2_p, ga_p],
                               axis=1).astype(jnp.bfloat16)            # (128, 640) bf16
    bias_slab = jnp.concatenate([pad2(b1[None, :], 1, FPAD),
                                 pad2(b2[None, :], 1, FPAD)], axis=1)  # (1, 256) f32
    return mat_slab, bias_slab, (E, f_out)


# ------------------------------- reference -----------------------------------
def reference_forward(x, edge_index, params):
    """Pure f32 JAX reference (matches the PyTorch module semantics)."""
    w1, b1, w2, b2 = params
    a_hat = build_gcn_adjacency(edge_index, x.shape[0])
    h = jnp.maximum(a_hat @ (x @ w1) + b1, 0.0)
    s = jax.nn.sigmoid(a_hat @ (h @ w2) + b2)
    return s[edge_index[0]]


if __name__ == "__main__":
    # Fixed graph from the module definition: 7 nodes, 2 features, 6 edges.
    edge_index = jnp.array([[0, 1, 2, 3, 4, 5],
                            [2, 2, 4, 4, 6, 6]], dtype=jnp.int32)
    x = jnp.array([[0, 1], [1, 0], [1, 1], [0, 1], [1, 1], [1, 0], [1, 1]],
                  dtype=jnp.float32)

    # Deterministic parameter init: GCNConv(2,16) and GCNConv(16,1).
    key = jax.random.PRNGKey(0)
    k1, k2 = jax.random.split(key)
    w1 = jax.random.normal(k1, (2, 16), jnp.float32) * (1.0 / jnp.sqrt(2.0))
    b1 = jnp.zeros((16,), jnp.float32)
    w2 = jax.random.normal(k2, (16, 1), jnp.float32) * (1.0 / jnp.sqrt(16.0))
    b2 = jnp.zeros((1,), jnp.float32)
    params = (w1, b1, w2, b2)

    # One-time static preprocessing (edge_index / params are fixed).
    mat_slab, bias_slab, (E, f_out) = prepare_gnn_inputs(x, edge_index, params)

    # Hot path: exactly one pallas_call on the prebuilt slabs.
    out_p = jax.block_until_ready(run_gnn(mat_slab, bias_slab))   # (EPAD, FPAD) f32
    edge_scores = out_p[:E, :f_out]                               # (6, 1)

    ref = jax.block_until_ready(reference_forward(x, edge_index, params))
    assert edge_scores.shape == (6, 1), edge_scores.shape
    # bf16 MXU operands (f32 accumulation) over 4 matmul stages -> loose bound
    # vs the pure-f32 reference.
    np.testing.assert_allclose(np.asarray(edge_scores), np.asarray(ref),
                               rtol=5e-2, atol=3e-2)
    print("KERNEL_OK")
</pallas_src>

<mosaic_0001>
module attributes {stable_mosaic.version = 11 : i64} {
  func.func @gnn_kernel(%arg0: memref<128x640xbf16, #tpu.memory_space<vmem>>, %arg1: memref<1x256xf32, #tpu.memory_space<vmem>>, %arg2: memref<8x128xf32, #tpu.memory_space<vmem>>) attributes {dimension_semantics = [], scalar_prefetch = 0 : i64, scratch_operands = 0 : i64, tpu.core_type = #tpu.core_type<tc>} {
    %c0 = arith.constant 0 : index
    %c0_0 = arith.constant 0 : index
    %0 = vector.load %arg0[%c0, %c0_0] : memref<128x640xbf16, #tpu.memory_space<vmem>>, vector<128x128xbf16>
    %c0_1 = arith.constant 0 : index
    %c128 = arith.constant 128 : index
    %1 = vector.load %arg0[%c0_1, %c128] : memref<128x640xbf16, #tpu.memory_space<vmem>>, vector<128x128xbf16>
    %c0_2 = arith.constant 0 : index
    %c256 = arith.constant 256 : index
    %2 = vector.load %arg0[%c0_2, %c256] : memref<128x640xbf16, #tpu.memory_space<vmem>>, vector<128x128xbf16>
    %c0_3 = arith.constant 0 : index
    %c384 = arith.constant 384 : index
    %3 = vector.load %arg0[%c0_3, %c384] : memref<128x640xbf16, #tpu.memory_space<vmem>>, vector<128x128xbf16>
    %c0_4 = arith.constant 0 : index
    %c512 = arith.constant 512 : index
    %4 = vector.load %arg0[%c0_4, %c512] : memref<128x640xbf16, #tpu.memory_space<vmem>>, vector<8x128xbf16>
    %c0_5 = arith.constant 0 : index
    %c0_6 = arith.constant 0 : index
    %5 = vector.load %arg1[%c0_5, %c0_6] : memref<1x256xf32, #tpu.memory_space<vmem>>, vector<1x128xf32>
    %c0_7 = arith.constant 0 : index
    %c128_8 = arith.constant 128 : index
    %6 = vector.load %arg1[%c0_7, %c128_8] : memref<1x256xf32, #tpu.memory_space<vmem>>, vector<1x128xf32>
    %cst = arith.constant dense<0.000000e+00> : vector<128x128xf32>
    %7 = tpu.matmul %0, %1, %cst {dimension_numbers = #tpu.dot_dimension_numbers<[1], [0], [0], [1], [0, 0, 1, 1], [], []>} : vector<128x128xbf16>, vector<128x128xbf16>, vector<128x128xf32> -> vector<128x128xf32>
    %8 = arith.truncf %7 : vector<128x128xf32> to vector<128x128xbf16>
    %cst_9 = arith.constant dense<0.000000e+00> : vector<128x128xf32>
    %9 = tpu.matmul %2, %8, %cst_9 {dimension_numbers = #tpu.dot_dimension_numbers<[1], [0], [0], [1], [0, 0, 1, 1], [], []>} : vector<128x128xbf16>, vector<128x128xbf16>, vector<128x128xf32> -> vector<128x128xf32>
    %10 = vector.broadcast %5 : vector<1x128xf32> to vector<128x128xf32>
    %11 = arith.addf %9, %10 : vector<128x128xf32>
    %cst_10 = arith.constant 0.000000e+00 : f32
    %12 = vector.broadcast %cst_10 : f32 to vector<128x128xf32>
    %13 = arith.maximumf %11, %12 : vector<128x128xf32>
    %14 = arith.truncf %13 : vector<128x128xf32> to vector<128x128xbf16>
    %cst_11 = arith.constant dense<0.000000e+00> : vector<128x128xf32>
    %15 = tpu.matmul %14, %3, %cst_11 {dimension_numbers = #tpu.dot_dimension_numbers<[1], [0], [0], [1], [0, 0, 1, 1], [], []>} : vector<128x128xbf16>, vector<128x128xbf16>, vector<128x128xf32> -> vector<128x128xf32>
    %16 = arith.truncf %15 : vector<128x128xf32> to vector<128x128xbf16>
    %cst_12 = arith.constant dense<0.000000e+00> : vector<8x128xf32>
    %17 = tpu.matmul %4, %16, %cst_12 {dimension_numbers = #tpu.dot_dimension_numbers<[1], [0], [0], [1], [0, 0, 1, 1], [], []>} : vector<8x128xbf16>, vector<128x128xbf16>, vector<8x128xf32> -> vector<8x128xf32>
    %18 = vector.broadcast %6 : vector<1x128xf32> to vector<8x128xf32>
    %19 = arith.addf %17, %18 : vector<8x128xf32>
    %20 = arith.negf %19 : vector<8x128xf32>
    %21 = math.exp %20 : vector<8x128xf32>
    %cst_13 = arith.constant 1.000000e+00 : f32
    %22 = vector.broadcast %cst_13 : f32 to vector<8x128xf32>
    %23 = arith.addf %22, %21 : vector<8x128xf32>
    %24 = arith.divf %22, %23 : vector<8x128xf32>
    %c0_14 = arith.constant 0 : index
    %c0_15 = arith.constant 0 : index
    %25 = vector.load %arg2[%c0_14, %c0_15] : memref<8x128xf32, #tpu.memory_space<vmem>>, vector<8x128xf32>
    tpu.vector_store %arg2[%c0_14, %c0_15], %24 {strides = array<i32>} : memref<8x128xf32, #tpu.memory_space<vmem>>, vector<8x128xf32>,
    return
  }
}

</mosaic_0001>

<bundles_post_ra>
// kernel: run_gnn.1
= control target key start
LH: loop header
LB: loop body
LE: loop exit
PB: predicated region body
PF: predicated region fallthrough
CT: control target
= control target key end

     0   :  { %7 = vsyncpa [#allocation3], 0  ;;  %s1040_s0 = inlined_call_operand.hbm [shape: bf16[128,640], index: 0, kind: input, shape index: {}]   ;;  %s1041_s1 = inlined_call_operand.vmem [shape: f32[1,256], index: 1, kind: input, shape index: {}]   ;;  %s1042_s2 = inlined_call_operand.hbm [shape: f32[8,128], index: 2, kind: output, shape index: {}]  }
   0x1   :  { %8 = vsyncpa [#allocation4], 0  ;;  %s989_s9 = smov [#allocation2]   ;;  %s941_s13 = scalar_lea.hbm %s1040_s0, 5120 }
   0x2   :  { %s14_s10 = sshll.u32 %s989_s9, 4  ;;  %p942_p0 = scmp.ne.s32.totalorder %s1040_s0, %s941_s13  ;;  %s15_s10 = int_to_ptr.vmem [resolvable:$true] %s14_s10 }
   0x3   :  { %p945_p1 = scmp.lt.u32.totalorder %s941_s13, %s1040_s0 }
   0x5   :  { %p947_p2 = pnand %p945_p1, %p942_p0 }
   0x7   :  { %950 = shalt.err (!%p947_p2)
}
   0x8   :  { %s951_s18 = scalar_lea.vmem %s15_s10, 5120  ;;  %p956_p4 = scmp.lt.s32.totalorder %s15_s10, %s15_s10 }
   0x9   :  { %p952_p3 = scmp.ne.s32.totalorder %s15_s10, %s951_s18  ;;  %p957_p5 = scmp.lt.s32.totalorder %s951_s18, %s951_s18 }
   0xb   :  { %p958_p6 = por %p957_p5, %p956_p4 }
   0xd   :  { %p959_p7 = pnand %p958_p6, %p952_p3 }
   0xf   :  { %962 = shalt.err (!%p959_p7)
}
  0x10   :  { %s990_s19 = smov 320   ;;  %s991_s20 = smov 20  }
  0x11   :  { %20 = dma.hbm_to_vmem [thread:$0]  %s1040_s0, 5120, %s15_s10, [#allocation3], %s990_s19, %s990_s19, %s991_s20  }
  0x12   :  { %985 = dma.done.wait [#allocation3], 5120  }
  0x13   :  { %986 = vsyncadd [#allocation3], 4294962176  ;;  %v905_v0 = vld [vmem:[#allocation2 + $0x4] ss:$20 sps:$4 sm:$0xff]   ;;  %v906_v1 = vld [vmem:[#allocation2 + $0x2c] ss:$20 sps:$4 sm:$0xff]  }
  0x14   :  { %783 = vmatprep.subr.bf16.mxu0 %v905_v0  ;;  %v907_v2 = vld [vmem:[#allocation2 + $0x54] ss:$20 sps:$4 sm:$0xff]   ;;  %v908_v3 = vld [vmem:[#allocation2 + $0x7c] ss:$20 sps:$4 sm:$0xff]   ;;  %v909_v5 = vld [vmem:[#allocation2 + $0xa4] ss:$20 sps:$4 sm:$0xff]  }
  0x15   :  { %784 = vmatpush3.bf16.msra.mxu0 %v905_v0  ;;  %v913_v4 = vld [vmem:[#allocation2] ss:$20 sps:$4 sm:$0xff]   ;;  %v912_v8 = vld [vmem:[#allocation2 + $0x11c] ss:$20 sps:$4 sm:$0xff]   ;;  %v916_v11 = vld [vmem:[#allocation2 + $0x78] ss:$20 sps:$4 sm:$0xff]  }
  0x16   :  { %785 = vmatprep.subr.bf16.mxu0 %v906_v1  ;;  %799 = vmatprep.mubr.bf16.mxu0 %v913_v4  ;;  %v910_v6 = vld [vmem:[#allocation2 + $0xcc] ss:$20 sps:$4 sm:$0xff]   ;;  %v911_v7 = vld [vmem:[#allocation2 + $0xf4] ss:$20 sps:$4 sm:$0xff]   ;;  %v915_v10 = vld [vmem:[#allocation2 + $0x50] ss:$20 sps:$4 sm:$0xff]  }
  0x17   :  { %v914_v9 = vld [vmem:[#allocation2 + $0x28] ss:$20 sps:$4 sm:$0xff]   ;;  %v917_v12 = vld [vmem:[#allocation2 + $0xa0] ss:$20 sps:$4 sm:$0xff]   ;;  %v919_v14 = vld [vmem:[#allocation2 + $0xf0] ss:$20 sps:$4 sm:$0xff]  }
  0x18   :  { %v918_v13 = vld [vmem:[#allocation2 + $0xc8] ss:$20 sps:$4 sm:$0xff]   ;;  %v920_v15 = vld [vmem:[#allocation2 + $0x118] ss:$20 sps:$4 sm:$0xff]   ;;  %v922_v47 = vld [vmem:[#allocation2 + $0x30] ss:$20 sps:$4 sm:$0xff]  }
  0x19   :  { %786 = vmatpush3.bf16.msra.mxu0 %v906_v1  ;;  %v921_v16 = vld [vmem:[#allocation2 + $0x8] ss:$20 sps:$4 sm:$0xff]   ;;  %v929_v17 = vld [vmem:[#allocation2 + $0xc] ss:$20 sps:$4 sm:$0xff]   ;;  %v932_v20 = vld [vmem:[#allocation2 + $0x84] ss:$20 sps:$4 sm:$0xff]  }
  0x1a   :  { %787 = vmatprep.subr.bf16.mxu0 %v907_v2  ;;  %831 = vmatprep.mubr.bf16.mxu1 %v921_v16  ;;  %v930_v18 = vld [vmem:[#allocation2 + $0x34] ss:$20 sps:$4 sm:$0xff]   ;;  %v931_v19 = vld [vmem:[#allocation2 + $0x5c] ss:$20 sps:$4 sm:$0xff]   ;;  %v933_v21 = vld [vmem:[#allocation2 + $0xac] ss:$20 sps:$4 sm:$0xff]  }
  0x1b   :  { %v934_v22 = vld [vmem:[#allocation2 + $0xd4] ss:$20 sps:$4 sm:$0xff]   ;;  %v923_v48 = vld [vmem:[#allocation2 + $0x58] ss:$20 sps:$4 sm:$0xff]   ;;  %v926_v51 = vld [vmem:[#allocation2 + $0xd0] ss:$20 sps:$4 sm:$0xff]  }
  0x1c   :  { %v924_v49 = vld [vmem:[#allocation2 + $0x80] ss:$20 sps:$4 sm:$0xff]   ;;  %v925_v50 = vld [vmem:[#allocation2 + $0xa8] ss:$20 sps:$4 sm:$0xff]   ;;  %v927_v52 = vld [vmem:[#allocation2 + $0xf8] ss:$20 sps:$4 sm:$0xff]  }
  0x1d   :  { %788 = vmatpush3.bf16.msra.mxu0 %v907_v2  ;;  %v928_v53 = vld [vmem:[#allocation2 + $0x120] ss:$20 sps:$4 sm:$0xff]   ;;  %v935_v54 = vld [vmem:[#allocation2 + $0xfc] ss:$20 sps:$4 sm:$0xff]   ;;  %v936_v55 = vld [vmem:[#allocation2 + $0x124] ss:$20 sps:$4 sm:$0xff]  }
  0x1e   :  { %789 = vmatprep.subr.bf16.mxu0 %v908_v3  ;;  %v707_v56 = vld [vmem:[%s1041_s1] ss:$0 sm:$0xff]  ;;  %vm993_vm0 = vmmov 0   ;;  %s994_s26 = smov [#allocation5]  }
  0x1f   :  { %s682_s27 = sshll.u32 %s994_s26, 4  ;;  %s683_s27 = int_to_ptr.vmem [resolvable:$true] %s682_s27 }
  0x20   :  { %s963_s28 = scalar_lea.vmem %s683_s27, 128  ;;  %p968_p9 = scmp.lt.s32.totalorder %s683_s27, %s683_s27 }
  0x21   :  { %790 = vmatpush3.bf16.msra.mxu0 %v908_v3  ;;  %p964_p8 = scmp.ne.s32.totalorder %s683_s27, %s963_s28  ;;  %p969_p10 = scmp.lt.s32.totalorder %s963_s28, %s963_s28 }
  0x22   :  { %791 = vmatprep.subr.bf16.mxu0 %v909_v5 }
  0x23   :  { %p970_p11 = por %p969_p10, %p968_p9 }
  0x25   :  { %792 = vmatpush3.bf16.msra.mxu0 %v909_v5  ;;  %p971_p12 = pnand %p970_p11, %p964_p8 }
  0x26   :  { %793 = vmatprep.subr.bf16.mxu0 %v910_v6 }
  0x29   :  { %794 = vmatpush3.bf16.msra.mxu0 %v910_v6 }
  0x2a   :  { %795 = vmatprep.subr.bf16.mxu0 %v911_v7 }
  0x2d   :  { %796 = vmatpush3.bf16.msra.mxu0 %v911_v7 }
  0x2e   :  { %797 = vmatprep.subr.bf16.mxu0 %v912_v8 }
  0x31   :  { %798 = vmatpush3.bf16.msra.mxu0 %v912_v8 }
  0x32   :  { %847 = vmatprep.subr.bf16.mxu0 %v929_v17 }
  0x34   :  { %800 = vmatmul.mubr.bf16.vlgmr.msra.gmra.mrb[0].mxu0 %v914_v9 }
  0x35   :  { %803 = vmatprep.mubr.bf16.mxu0 %v915_v10  ;;  %848 = vmatpush3.bf16.msra.mxu0 %v929_v17 }
  0x36   :  { %849 = vmatprep.subr.bf16.mxu0 %v930_v18 }
  0x39   :  { %850 = vmatpush3.bf16.msra.mxu0 %v930_v18 }
  0x3a   :  { %851 = vmatprep.subr.bf16.mxu0 %v931_v19 }
  0x3c   :  { %804 = vmatmul.mubr.bf16.gmra.mrb[4].mxu0 %v916_v11 }
  0x3d   :  { %807 = vmatprep.mubr.bf16.mxu0 %v917_v12  ;;  %852 = vmatpush3.bf16.msra.mxu0 %v931_v19 }
  0x3e   :  { %853 = vmatprep.subr.bf16.mxu0 %v932_v20 }
  0x41   :  { %854 = vmatpush3.bf16.msra.mxu0 %v932_v20 }
  0x42   :  { %855 = vmatprep.subr.bf16.mxu0 %v933_v21 }
  0x44   :  { %808 = vmatmul.mubr.bf16.gmra.mrb[8].mxu0 %v918_v13 }
  0x45   :  { %811 = vmatprep.mubr.bf16.mxu0 %v919_v14  ;;  %856 = vmatpush3.bf16.msra.mxu0 %v933_v21 }
  0x46   :  { %857 = vmatprep.subr.bf16.mxu0 %v934_v22 }
  0x49   :  { %858 = vmatpush3.bf16.msra.mxu0 %v934_v22 }
  0x4a   :  { %859 = vmatprep.subr.bf16.mxu0 %v935_v54 }
  0x4c   :  { %812 = vmatmul.mubr.bf16.gmra.mrb[12].mxu0 %v920_v15 }
  0x4d   :  { %860 = vmatpush3.bf16.msra.mxu0 %v935_v54 }
  0x4e   :  { %861 = vmatprep.subr.bf16.mxu0 %v936_v55 }
  0x51   :  { %862 = vmatpush3.bf16.msra.mxu0 %v936_v55 }
 0x107   :  { %v801_v23 = vpop.f32.mrb[0].mxu0 }
 0x108   :  { %v224_v24 = vpop.f32.mrb[1].mxu0 }
 0x109   :  { %v802_v25 = vpop.f32.mrb[2].mxu0 }
 0x10a   :  { %v288_v26 = vpack.c.bf16 %v802_v25, %v801_v23  ;;  %v227_v27 = vpop.f32.mrb[3].mxu0 }
 0x10b   :  { %v287_v28 = vpack.c.bf16 %v227_v27, %v224_v24 }
 0x10d   :  { %815 = vmatprep.subr.bf16.mxu1 %v287_v28 }
 0x10e   :  { %816 = vmatpush3.bf16.msra.mxu1 %v287_v28 }
 0x10f   :  { %v805_v29 = vpop.f32.mrb[4].mxu0  ;;  %817 = vmatprep.subr.bf16.mxu1 %v288_v26 }
 0x110   :  { %v240_v30 = vpop.f32.mrb[5].mxu0 }
 0x111   :  { %v806_v31 = vpop.f32.mrb[6].mxu0 }
 0x112   :  { %v290_v32 = vpack.c.bf16 %v806_v31, %v805_v29  ;;  %v243_v33 = vpop.f32.mrb[7].mxu0  ;;  %818 = vmatpush3.bf16.msra.mxu1 %v288_v26 }
 0x113   :  { %v289_v34 = vpack.c.bf16 %v243_v33, %v240_v30 }
 0x115   :  { %819 = vmatprep.subr.bf16.mxu1 %v289_v34 }
 0x116   :  { %820 = vmatpush3.bf16.msra.mxu1 %v289_v34 }
 0x117   :  { %v809_v35 = vpop.f32.mrb[8].mxu0  ;;  %821 = vmatprep.subr.bf16.mxu1 %v290_v32 }
 0x118   :  { %v256_v36 = vpop.f32.mrb[9].mxu0 }
 0x119   :  { %v810_v37 = vpop.f32.mrb[10].mxu0 }
 0x11a   :  { %v292_v38 = vpack.c.bf16 %v810_v37, %v809_v35  ;;  %v259_v39 = vpop.f32.mrb[11].mxu0  ;;  %822 = vmatpush3.bf16.msra.mxu1 %v290_v32 }
 0x11b   :  { %v291_v40 = vpack.c.bf16 %v259_v39, %v256_v36 }
 0x11d   :  { %823 = vmatprep.subr.bf16.mxu1 %v291_v40 }
 0x11e   :  { %824 = vmatpush3.bf16.msra.mxu1 %v291_v40 }
 0x11f   :  { %v813_v41 = vpop.f32.mrb[12].mxu0  ;;  %825 = vmatprep.subr.bf16.mxu1 %v292_v38 }
 0x120   :  { %v272_v42 = vpop.f32.mrb[13].mxu0 }
 0x121   :  { %v814_v43 = vpop.f32.mrb[14].mxu0 }
 0x122   :  { %v294_v44 = vpack.c.bf16 %v814_v43, %v813_v41  ;;  %v275_v45 = vpop.f32.mrb[15].mxu0  ;;  %826 = vmatpush3.bf16.msra.mxu1 %v292_v38 }
 0x123   :  { %v293_v46 = vpack.c.bf16 %v275_v45, %v272_v42 }
 0x125   :  { %827 = vmatprep.subr.bf16.mxu1 %v293_v46 }
 0x126   :  { %828 = vmatpush3.bf16.msra.mxu1 %v293_v46 }
 0x127   :  { %829 = vmatprep.subr.bf16.mxu1 %v294_v44 }
 0x12a   :  { %830 = vmatpush3.bf16.msra.mxu1 %v294_v44 }
 0x12d   :  { %832 = vmatmul.mubr.bf16.vlgmr.msra.gmra.mrb[0].mxu1 %v922_v47 }
 0x12e   :  { %835 = vmatprep.mubr.bf16.mxu1 %v923_v48 }
 0x135   :  { %836 = vmatmul.mubr.bf16.gmra.mrb[4].mxu1 %v924_v49  ;;  %v992_v49 = vmov 0.0  }
 0x136   :  { %839 = vmatprep.mubr.bf16.mxu1 %v925_v50  ;;  %879 = vmatprep.subr.bf16.mxu1 %v992_v49 }
 0x13d   :  { %840 = vmatmul.mubr.bf16.gmra.mrb[8].mxu1 %v926_v51 }
 0x13e   :  { %843 = vmatprep.mubr.bf16.mxu1 %v927_v52 }
 0x145   :  { %844 = vmatmul.mubr.bf16.gmra.mrb[12].mxu1 %v928_v53 }
 0x146   :  { %895 = vmatprep.mubr.msk.bf16.mxu1 %vm993_vm0, %v992_v49 }
 0x200   :  { %v833_v57 = vpop.f32.mrb[0].mxu1 }
 0x201   :  { %v392_v58 = vadd.f32 %v833_v57, %v707_v56  ;;  %v383_v59 = vpop.f32.mrb[1].mxu1 }
 0x202   :  { %v384_v60 = vadd.f32 %v707_v56, %v383_v59  ;;  %v834_v61 = vpop.f32.mrb[2].mxu1 }
 0x203   :  { %v395_v62 = vadd.f32 %v834_v61, %v707_v56  ;;  %v386_v63 = vpop.f32.mrb[3].mxu1  ;;  %v448_v1 = vmax.f32 %v392_v58, 0.0 }
 0x204   :  { %v387_v0 = vadd.f32 %v707_v56, %v386_v63  ;;  %v446_v3 = vmax.f32 %v384_v60, 0.0 }
 0x205   :  { %v449_v2 = vmax.f32 %v395_v62, 0.0 }
 0x206   :  { %v447_v4 = vmax.f32 %v387_v0, 0.0 }
 0x207   :  { %v463_v5 = vpack.c.bf16 %v449_v2, %v448_v1 }
 0x208   :  { %v462_v6 = vpack.c.bf16 %v447_v4, %v446_v3  ;;  %v837_v7 = vpop.f32.mrb[4].mxu1 }
 0x209   :  { %v408_v8 = vadd.f32 %v837_v7, %v707_v56  ;;  %v399_v9 = vpop.f32.mrb[5].mxu1 }
 0x20a   :  { %v400_v10 = vadd.f32 %v707_v56, %v399_v9  ;;  %v838_v11 = vpop.f32.mrb[6].mxu1  ;;  %863 = vmatprep.mubr.bf16.mxu0 %v462_v6 }
 0x20b   :  { %v411_v12 = vadd.f32 %v838_v11, %v707_v56  ;;  %v402_v13 = vpop.f32.mrb[7].mxu1  ;;  %864 = vmatmul.mubr.bf16.vlgmr.msra.gmra.mrb[16].mxu0 %v463_v5  ;;  %v452_v15 = vmax.f32 %v408_v8, 0.0  ;;  %v724_v11 = vld [vmem:[%s1041_s1 + $0x1] ss:$0 sm:$0xff] }
 0x20c   :  { %v403_v14 = vadd.f32 %v707_v56, %v402_v13  ;;  %v450_v17 = vmax.f32 %v400_v10, 0.0  ;;  %v91_v10 = vld [vmem:[#allocation2 + $0x10] sm:$0xf] }
 0x20d   :  { %v453_v16 = vmax.f32 %v411_v12, 0.0 }
 0x20e   :  { %v451_v18 = vmax.f32 %v403_v14, 0.0 }
 0x20f   :  { %v465_v19 = vpack.c.bf16 %v453_v16, %v452_v15 }
 0x210   :  { %v464_v20 = vpack.c.bf16 %v451_v18, %v450_v17  ;;  %v841_v21 = vpop.f32.mrb[8].mxu1 }
 0x211   :  { %v424_v22 = vadd.f32 %v841_v21, %v707_v56  ;;  %v415_v23 = vpop.f32.mrb[9].mxu1 }
 0x212   :  { %v416_v24 = vadd.f32 %v707_v56, %v415_v23  ;;  %v842_v25 = vpop.f32.mrb[10].mxu1  ;;  %867 = vmatprep.mubr.bf16.mxu0 %v464_v20 }
 0x213   :  { %v427_v26 = vadd.f32 %v842_v25, %v707_v56  ;;  %v418_v27 = vpop.f32.mrb[11].mxu1  ;;  %868 = vmatmul.mubr.bf16.gmra.mrb[20].mxu0 %v465_v19  ;;  %v456_v29 = vmax.f32 %v424_v22, 0.0 }
 0x214   :  { %v419_v28 = vadd.f32 %v707_v56, %v418_v27  ;;  %v454_v31 = vmax.f32 %v416_v24, 0.0 }
 0x215   :  { %v457_v30 = vmax.f32 %v427_v26, 0.0 }
 0x216   :  { %v455_v32 = vmax.f32 %v419_v28, 0.0 }
 0x217   :  { %v467_v33 = vpack.c.bf16 %v457_v30, %v456_v29 }
 0x218   :  { %v466_v34 = vpack.c.bf16 %v455_v32, %v454_v31  ;;  %v845_v35 = vpop.f32.mrb[12].mxu1 }
 0x219   :  { %v440_v36 = vadd.f32 %v845_v35, %v707_v56  ;;  %v431_v37 = vpop.f32.mrb[13].mxu1 }
 0x21a   :  { %v432_v38 = vadd.f32 %v707_v56, %v431_v37  ;;  %v846_v39 = vpop.f32.mrb[14].mxu1  ;;  %871 = vmatprep.mubr.bf16.mxu0 %v466_v34 }
 0x21b   :  { %v443_v40 = vadd.f32 %v846_v39, %v707_v56  ;;  %v434_v41 = vpop.f32.mrb[15].mxu1  ;;  %872 = vmatmul.mubr.bf16.gmra.mrb[24].mxu0 %v467_v33  ;;  %v460_v43 = vmax.f32 %v440_v36, 0.0 }
 0x21c   :  { %v435_v42 = vadd.f32 %v707_v56, %v434_v41  ;;  %v458_v45 = vmax.f32 %v432_v38, 0.0 }
 0x21d   :  { %v461_v44 = vmax.f32 %v443_v40, 0.0 }
 0x21e   :  { %v459_v46 = vmax.f32 %v435_v42, 0.0 }
 0x21f   :  { %v469_v47 = vpack.c.bf16 %v461_v44, %v460_v43 }
 0x220   :  { %v468_v48 = vpack.c.bf16 %v459_v46, %v458_v45 }
 0x222   :  { %875 = vmatprep.mubr.bf16.mxu0 %v468_v48 }
 0x223   :  { %876 = vmatmul.mubr.bf16.gmra.mrb[28].mxu0 %v469_v47 }
 0x2de   :  { %v865_v50 = vpop.f32.mrb[16].mxu0 }
 0x2df   :  { %v552_v51 = vpop.f32.mrb[17].mxu0 }
 0x2e0   :  { %v866_v52 = vpop.f32.mrb[18].mxu0 }
 0x2e1   :  { %v616_v53 = vpack.c.bf16 %v866_v52, %v865_v50  ;;  %v555_v54 = vpop.f32.mrb[19].mxu0 }
 0x2e2   :  { %v615_v55 = vpack.c.bf16 %v555_v54, %v552_v51 }
 0x2e4   :  { %880 = vmatpush3.bf16.msra.mxu1 %v615_v55 }
 0x2e5   :  { %881 = vmatprep.subr.bf16.mxu1 %v992_v49 }
 0x2e6   :  { %v869_v56 = vpop.f32.mrb[20].mxu0 }
 0x2e7   :  { %v568_v57 = vpop.f32.mrb[21].mxu0 }
 0x2e8   :  { %v870_v58 = vpop.f32.mrb[22].mxu0  ;;  %882 = vmatpush3.bf16.msra.mxu1 %v616_v53 }
 0x2e9   :  { %v618_v59 = vpack.c.bf16 %v870_v58, %v869_v56  ;;  %v571_v60 = vpop.f32.mrb[23].mxu0  ;;  %883 = vmatprep.subr.bf16.mxu1 %v992_v49 }
 0x2ea   :  { %v617_v61 = vpack.c.bf16 %v571_v60, %v568_v57 }
 0x2ec   :  { %884 = vmatpush3.bf16.msra.mxu1 %v617_v61 }
 0x2ed   :  { %885 = vmatprep.subr.bf16.mxu1 %v992_v49 }
 0x2ee   :  { %v873_v62 = vpop.f32.mrb[24].mxu0 }
 0x2ef   :  { %v584_v63 = vpop.f32.mrb[25].mxu0 }
 0x2f0   :  { %v874_v0 = vpop.f32.mrb[26].mxu0  ;;  %886 = vmatpush3.bf16.msra.mxu1 %v618_v59 }
 0x2f1   :  { %v620_v1 = vpack.c.bf16 %v874_v0, %v873_v62  ;;  %v587_v2 = vpop.f32.mrb[27].mxu0  ;;  %887 = vmatprep.subr.bf16.mxu1 %v992_v49 }
 0x2f2   :  { %v619_v3 = vpack.c.bf16 %v587_v2, %v584_v63 }
 0x2f4   :  { %888 = vmatpush3.bf16.msra.mxu1 %v619_v3 }
 0x2f5   :  { %889 = vmatprep.subr.bf16.mxu1 %v992_v49 }
 0x2f6   :  { %v877_v4 = vpop.f32.mrb[28].mxu0 }
 0x2f7   :  { %v600_v5 = vpop.f32.mrb[29].mxu0 }
 0x2f8   :  { %v878_v6 = vpop.f32.mrb[30].mxu0  ;;  %890 = vmatpush3.bf16.msra.mxu1 %v620_v1 }
 0x2f9   :  { %v622_v7 = vpack.c.bf16 %v878_v6, %v877_v4  ;;  %v603_v8 = vpop.f32.mrb[31].mxu0  ;;  %891 = vmatprep.subr.bf16.mxu1 %v992_v49 }
 0x2fa   :  { %v621_v9 = vpack.c.bf16 %v603_v8, %v600_v5 }
 0x2fc   :  { %892 = vmatpush3.bf16.msra.mxu1 %v621_v9 }
 0x2fd   :  { %893 = vmatprep.subr.bf16.mxu1 %v992_v49 }
 0x300   :  { %894 = vmatpush3.bf16.msra.mxu1 %v622_v7 }
 0x303   :  { %896 = vmatmul.mubr.bf16.vlgmr.msra.gmra.mrb[16].mxu1 %v91_v10 }
 0x3d6   :  { %v663_v12 = vpop.f32.mrb[16].mxu1 }
 0x3d7   :  { %v664_v13 = vadd.f32 %v724_v11, %v663_v12  ;;  %v897_v14 = vpop.f32.mrb[17].mxu1 }
 0x3d8   :  { %v666_v15 = vpop.f32.mrb[18].mxu1 }
 0x3d9   :  { %v725_v16 = vmul.f32 -1.442695, %v664_v13  ;;  %v898_v17 = vpop.f32.mrb[19].mxu1 }
 0x3db   :  { %937 = vpow2.f32 %v725_v16 }
 0x3e5   :  { %v938_v18 = vpop.eup %937 }
 0x3e6   :  { %v672_v19 = vadd.f32 1.0, %v938_v18 }
 0x3e8   :  { %939 = vrcp.f32 %v672_v19 }
 0x3f2   :  { %v940_v20 = vpop.eup %939 }
 0x3f3   :  { %675 = vst [vmem:[#allocation5] sm:$0xff] %v940_v20 }
 0x3f4   :  { %974 = shalt.err (!%p971_p12)
}
 0x3f5   :  { %s975_s30 = scalar_lea.hbm %s1042_s2, 128 }
 0x3f6   :  { %p976_p13 = scmp.ne.s32.totalorder %s1042_s2, %s975_s30  ;;  %p979_p0 = scmp.lt.u32.totalorder %s975_s30, %s1042_s2 }
 0x3f8   :  { %p981_p1 = pnand %p979_p0, %p976_p13 }
 0x3fa   :  { %984 = shalt.err (!%p981_p1)
}
 0x3fb   :  { %685 = dma.vmem_to_hbm [thread:$0]  %s683_s27, 128, %s1042_s2, [#allocation4]  }
 0x3fc   :  { %987 = dma.done.wait [#allocation4], 128  }
 0x3fd   :  { %988 = vsyncadd [#allocation4], 4294967168 }
 0x3fe   :  { %689 = vsyncpa [#allocation3], 1 }
 0x3ff   :  { %690 = vsyncpa [#allocation4], 1 }

</bundles_post_ra>
